<compile_context>
chip_gen: v7x
topology: tpu7x:2x2x1
jax: 0.10.0
libtpu: 0.0.40
codegen_flags: <defaults>
</compile_context>

<pallas_src>
import functools

import jax
import jax.numpy as jnp
from jax.experimental import pallas as pl
from jax.experimental.pallas import tpu as pltpu


def _yolo_kernel(x_ref, o_ref, *, stride, grid_size, num_attrib, anchors,
                 lane_tile):
    # x_ref / o_ref: (1, C, L) f32 blocks, channel-major, spatial on lanes.
    v = x_ref[0]                                   # (C, L), lane-dense
    C, L = v.shape
    stride_f = jnp.float32(stride)
    attrib_f = jnp.float32(num_attrib)

    # Dense activation passes over the whole tile (single EUP pass each; no
    # thin per-anchor slices).  exp() of non-w/h rows is discarded by where().
    sig = jax.nn.sigmoid(v)
    ex = jnp.exp(v)

    # Per-channel (sublane) masks and anchor constants, shape (C, 1), built
    # from iota (constant along lanes, broadcast for free in the selects).
    c_col = jax.lax.broadcasted_iota(jnp.int32, (C, 1), 0).astype(jnp.float32)
    a_col = jnp.floor(c_col / attrib_f)            # anchor index per channel
    k_col = c_col - a_col * attrib_f               # attrib index within anchor
    is_x = k_col < 0.5                             # k == 0
    is_xy = k_col < 1.5                            # k in {0, 1}
    is_box = k_col < 3.5                           # k in {0, 1, 2, 3}

    anch_w = jnp.zeros((C, 1), jnp.float32)
    anch_h = jnp.zeros((C, 1), jnp.float32)
    for ai, (aw, ah) in enumerate(anchors):        # static unroll, A is tiny
        sel = a_col == jnp.float32(ai)
        anch_w = jnp.where(sel, jnp.float32(aw / stride), anch_w)
        anch_h = jnp.where(sel, jnp.float32(ah / stride), anch_h)
    anch_col = jnp.where(k_col < 2.5, anch_w, anch_h)   # k==2 -> w, k==3 -> h

    # Grid-cell offsets from program_id + lane iota (no streamed table).
    # Float divide/floor is exact for these small integer magnitudes.
    base = (pl.program_id(1) * lane_tile).astype(jnp.float32)
    lane = jax.lax.broadcasted_iota(jnp.int32, (1, L), 1).astype(jnp.float32)
    s = base + lane                                # flat spatial index h*G + w
    h_off = jnp.floor(s / jnp.float32(grid_size))
    w_off = s - h_off * jnp.float32(grid_size)
    off = jnp.where(is_x, w_off, h_off)            # (C, L) via broadcast

    # Decode: xy = (sigmoid + offset) * stride ; wh = exp * (anchor/stride) * stride
    # (matches the PyTorch op order bit-for-bit when stride is a power of two);
    # obj / class scores = sigmoid.
    xy = sig + off
    wh = ex * anch_col
    box = jnp.where(is_xy, xy, wh) * stride_f
    o_ref[0] = jnp.where(is_box, box, sig)


def _pick_lane_tile(GG, C, B):
    """Largest lane tile under a conservative VMEM budget (v7x-safe)."""
    budget = 6 * 1024 * 1024                       # in+out, double-buffered
    per_lane_bytes = 2 * 2 * C * 4
    cap = max(128, (budget // per_lane_bytes) // 128 * 128)
    lane_tile = GG if GG <= cap else cap
    # v7x has 2 TensorCores: if B == 1, split the spatial axis so both get work.
    if B == 1 and lane_tile >= GG and GG > 128:
        half = (((GG + 1) // 2) + 127) // 128 * 128
        if half < GG:
            lane_tile = half
    return lane_tile


def yolo_layer_forward(x, anchors, num_class, img_dim):
    """x: (B, A*(5+num_class), G, G) NCHW. Returns (B, G*G*A, 5+num_class)."""
    B, C, G, G2 = x.shape
    assert G == G2
    attrib = 5 + num_class
    anchors_t = tuple(
        (float(w), float(h))
        for (w, h) in (anchors.tolist() if hasattr(anchors, "tolist") else anchors))
    A = len(anchors_t)
    assert C == A * attrib
    stride = img_dim // G                          # static python int
    GG = G * G

    # Free reshape only (no input transpose): channel-major, spatial on lanes.
    x_cm = x.reshape(B, C, GG).astype(jnp.float32)

    lane_tile = _pick_lane_tile(GG, C, B)
    n_sp = pl.cdiv(GG, lane_tile)

    kernel = functools.partial(_yolo_kernel, stride=stride, grid_size=G,
                               num_attrib=attrib, anchors=anchors_t,
                               lane_tile=lane_tile)

    out_cm = pl.pallas_call(
        kernel,
        out_shape=jax.ShapeDtypeStruct((B, C, GG), jnp.float32),
        grid_spec=pltpu.PrefetchScalarGridSpec(
            num_scalar_prefetch=0,
            grid=(B, n_sp),
            in_specs=[pl.BlockSpec((1, C, lane_tile), lambda b, j: (b, 0, j))],
            out_specs=pl.BlockSpec((1, C, lane_tile), lambda b, j: (b, 0, j)),
        ),
        compiler_params=pltpu.CompilerParams(
            dimension_semantics=("parallel", "parallel"),
            vmem_limit_bytes=32 * 1024 * 1024),
    )(x_cm)

    # Layout swap to the consumer layout as one XLA transpose pass
    # (kernel stores stay lane-dense); the final reshape is free.
    return jnp.transpose(out_cm, (0, 2, 1)).reshape(B, GG * A, attrib)


def _reference_forward(x, anchors, num_class, img_dim):
    """Pure-JAX reference mirroring the PyTorch forward."""
    B, C, G, _ = x.shape
    A = anchors.shape[0]
    attrib = 5 + num_class
    stride = img_dim // G
    v = jnp.transpose(x, (0, 2, 3, 1)).reshape(B, G * G * A, attrib)
    w_idx = jnp.tile(jnp.repeat(jnp.arange(G), A), G).astype(jnp.float32)
    h_idx = jnp.repeat(jnp.arange(G), G * A).astype(jnp.float32)
    mesh = jnp.stack([w_idx, h_idx], axis=1)                 # (N, 2)
    xy = (jax.nn.sigmoid(v[:, :, :2]) + mesh[None]) * stride
    anch = jnp.tile(jnp.asarray(anchors, jnp.float32) / stride, (G * G, 1))
    wh = jnp.exp(v[:, :, 2:4]) * anch[None] * stride
    obj = jax.nn.sigmoid(v[:, :, 4:5])
    cls = jax.nn.sigmoid(v[:, :, 5:])
    return jnp.concatenate([xy, wh, obj, cls], axis=2)


if __name__ == "__main__":
    # "Parameters" from __init__: anchors and numClass, set deterministically.
    anchors = ((10.0, 13.0), (16.0, 30.0), (33.0, 23.0))
    num_class = 3                                  # numBBoxAttrib = 8
    A = len(anchors)
    B, G = 2, 16
    img_dim = 128                                  # stride = 8
    C = A * (5 + num_class)                        # 24

    key = jax.random.PRNGKey(0)
    x = jax.random.normal(key, (B, C, G, G), dtype=jnp.float32)

    out = jax.block_until_ready(yolo_layer_forward(x, anchors, num_class, img_dim))
    ref = _reference_forward(x, jnp.asarray(anchors, jnp.float32), num_class, img_dim)
    assert out.shape == (B, G * G * A, 5 + num_class)
    assert jnp.allclose(out, ref, atol=1e-3, rtol=1e-5), "mismatch vs reference (main)"

    # Small / odd grid (G*G < 128) and B == 1 sanity check.
    anchors2 = ((12.0, 20.0), (30.0, 44.0))
    num_class2 = 2
    B2, G2 = 1, 7
    img_dim2 = 112                                 # stride = 16
    C2 = len(anchors2) * (5 + num_class2)          # 14
    x2 = jax.random.normal(jax.random.PRNGKey(1), (B2, C2, G2, G2), jnp.float32)
    out2 = jax.block_until_ready(yolo_layer_forward(x2, anchors2, num_class2, img_dim2))
    ref2 = _reference_forward(x2, jnp.asarray(anchors2, jnp.float32), num_class2, img_dim2)
    assert out2.shape == (B2, G2 * G2 * len(anchors2), 5 + num_class2)
    assert jnp.allclose(out2, ref2, atol=1e-3, rtol=1e-5), "mismatch vs reference (small)"

    print("KERNEL_OK")
</pallas_src>

<mosaic_0001>
module attributes {stable_mosaic.version = 11 : i64} {
  func.func @_yolo_kernel(%arg0: i32, %arg1: i32, %arg2: memref<1x24x256xf32, #tpu.memory_space<vmem>>, %arg3: memref<1x24x256xf32, #tpu.memory_space<vmem>>) attributes {dimension_semantics = [#tpu.dimension_semantics<parallel>, #tpu.dimension_semantics<parallel>], iteration_bounds = array<i64: 2, 1>, scalar_prefetch = 0 : i64, scratch_operands = 0 : i64, tpu.core_type = #tpu.core_type<tc>, window_params = [{transform_indices = @transform_0, window_bounds = array<i64: 1, 24, 256>}, {transform_indices = @transform_1, window_bounds = array<i64: 1, 24, 256>}]} {
    %c0 = arith.constant 0 : index
    %c0_0 = arith.constant 0 : index
    %c0_1 = arith.constant 0 : index
    %0 = vector.load %arg2[%c0, %c0_0, %c0_1] : memref<1x24x256xf32, #tpu.memory_space<vmem>>, vector<1x24x256xf32>
    %1 = vector.shape_cast %0 : vector<1x24x256xf32> to vector<24x256xf32>
    %2 = arith.negf %1 : vector<24x256xf32>
    %3 = math.exp %2 : vector<24x256xf32>
    %cst = arith.constant 1.000000e+00 : f32
    %4 = vector.broadcast %cst : f32 to vector<24x256xf32>
    %5 = arith.addf %4, %3 : vector<24x256xf32>
    %6 = arith.divf %4, %5 : vector<24x256xf32>
    %7 = math.exp %1 : vector<24x256xf32>
    %8 = tpu.iota {dimensions = array<i32: 0>} : vector<24x1xi32>
    %9 = arith.sitofp %8 : vector<24x1xi32> to vector<24x1xf32>
    %cst_2 = arith.constant 8.000000e+00 : f32
    %10 = vector.broadcast %cst_2 : f32 to vector<24x1xf32>
    %11 = arith.divf %9, %10 : vector<24x1xf32>
    %12 = math.floor %11 : vector<24x1xf32>
    %cst_3 = arith.constant 8.000000e+00 : f32
    %13 = vector.broadcast %cst_3 : f32 to vector<24x1xf32>
    %14 = arith.mulf %12, %13 : vector<24x1xf32>
    %15 = arith.subf %9, %14 : vector<24x1xf32>
    %cst_4 = arith.constant 5.000000e-01 : f32
    %16 = vector.broadcast %cst_4 : f32 to vector<24x1xf32>
    %17 = arith.cmpf olt, %15, %16 : vector<24x1xf32>
    %cst_5 = arith.constant 1.500000e+00 : f32
    %18 = vector.broadcast %cst_5 : f32 to vector<24x1xf32>
    %19 = arith.cmpf olt, %15, %18 : vector<24x1xf32>
    %cst_6 = arith.constant 3.500000e+00 : f32
    %20 = vector.broadcast %cst_6 : f32 to vector<24x1xf32>
    %21 = arith.cmpf olt, %15, %20 : vector<24x1xf32>
    %cst_7 = arith.constant 0.000000e+00 : f32
    %22 = vector.broadcast %cst_7 : f32 to vector<24x1xf32>
    %cst_8 = arith.constant 0.000000e+00 : f32
    %23 = vector.broadcast %cst_8 : f32 to vector<24x1xf32>
    %cst_9 = arith.constant 0.000000e+00 : f32
    %24 = vector.broadcast %cst_9 : f32 to vector<24x1xf32>
    %25 = arith.cmpf oeq, %12, %24 : vector<24x1xf32>
    %cst_10 = arith.constant 1.250000e+00 : f32
    %26 = vector.broadcast %cst_10 : f32 to vector<24x1xf32>
    %27 = arith.select %25, %26, %22 : vector<24x1xi1>, vector<24x1xf32>
    %cst_11 = arith.constant 1.625000e+00 : f32
    %28 = vector.broadcast %cst_11 : f32 to vector<24x1xf32>
    %29 = arith.select %25, %28, %23 : vector<24x1xi1>, vector<24x1xf32>
    %cst_12 = arith.constant 1.000000e+00 : f32
    %30 = vector.broadcast %cst_12 : f32 to vector<24x1xf32>
    %31 = arith.cmpf oeq, %12, %30 : vector<24x1xf32>
    %cst_13 = arith.constant 2.000000e+00 : f32
    %32 = vector.broadcast %cst_13 : f32 to vector<24x1xf32>
    %33 = arith.select %31, %32, %27 : vector<24x1xi1>, vector<24x1xf32>
    %cst_14 = arith.constant 3.750000e+00 : f32
    %34 = vector.broadcast %cst_14 : f32 to vector<24x1xf32>
    %35 = arith.select %31, %34, %29 : vector<24x1xi1>, vector<24x1xf32>
    %cst_15 = arith.constant 2.000000e+00 : f32
    %36 = vector.broadcast %cst_15 : f32 to vector<24x1xf32>
    %37 = arith.cmpf oeq, %12, %36 : vector<24x1xf32>
    %cst_16 = arith.constant 4.125000e+00 : f32
    %38 = vector.broadcast %cst_16 : f32 to vector<24x1xf32>
    %39 = arith.select %37, %38, %33 : vector<24x1xi1>, vector<24x1xf32>
    %cst_17 = arith.constant 2.875000e+00 : f32
    %40 = vector.broadcast %cst_17 : f32 to vector<24x1xf32>
    %41 = arith.select %37, %40, %35 : vector<24x1xi1>, vector<24x1xf32>
    %cst_18 = arith.constant 2.500000e+00 : f32
    %42 = vector.broadcast %cst_18 : f32 to vector<24x1xf32>
    %43 = arith.cmpf olt, %15, %42 : vector<24x1xf32>
    %44 = arith.select %43, %39, %41 : vector<24x1xi1>, vector<24x1xf32>
    %c256_i32 = arith.constant 256 : i32
    %45 = arith.muli %arg1, %c256_i32 : i32
    %46 = arith.sitofp %45 : i32 to f32
    %47 = tpu.iota {dimensions = array<i32: 1>} : vector<1x256xi32>
    %48 = arith.sitofp %47 : vector<1x256xi32> to vector<1x256xf32>
    %49 = vector.broadcast %46 : f32 to vector<1x256xf32>
    %50 = arith.addf %49, %48 : vector<1x256xf32>
    %cst_19 = arith.constant 1.600000e+01 : f32
    %51 = vector.broadcast %cst_19 : f32 to vector<1x256xf32>
    %52 = arith.divf %50, %51 : vector<1x256xf32>
    %53 = math.floor %52 : vector<1x256xf32>
    %cst_20 = arith.constant 1.600000e+01 : f32
    %54 = vector.broadcast %cst_20 : f32 to vector<1x256xf32>
    %55 = arith.mulf %53, %54 : vector<1x256xf32>
    %56 = arith.subf %50, %55 : vector<1x256xf32>
    %57 = vector.shape_cast %17 : vector<24x1xi1> to vector<24x1xi1>
    %58 = vector.broadcast %57 : vector<24x1xi1> to vector<24x256xi1>
    %59 = vector.shape_cast %56 : vector<1x256xf32> to vector<1x256xf32>
    %60 = vector.broadcast %59 : vector<1x256xf32> to vector<24x256xf32>
    %61 = vector.shape_cast %53 : vector<1x256xf32> to vector<1x256xf32>
    %62 = vector.broadcast %61 : vector<1x256xf32> to vector<24x256xf32>
    %63 = arith.select %58, %60, %62 : vector<24x256xi1>, vector<24x256xf32>
    %64 = arith.addf %6, %63 : vector<24x256xf32>
    %65 = vector.broadcast %44 : vector<24x1xf32> to vector<24x256xf32>
    %66 = arith.mulf %7, %65 : vector<24x256xf32>
    %67 = vector.shape_cast %19 : vector<24x1xi1> to vector<24x1xi1>
    %68 = vector.broadcast %67 : vector<24x1xi1> to vector<24x256xi1>
    %69 = arith.select %68, %64, %66 : vector<24x256xi1>, vector<24x256xf32>
    %cst_21 = arith.constant 8.000000e+00 : f32
    %70 = vector.broadcast %cst_21 : f32 to vector<24x256xf32>
    %71 = arith.mulf %69, %70 : vector<24x256xf32>
    %72 = vector.shape_cast %21 : vector<24x1xi1> to vector<24x1xi1>
    %73 = vector.broadcast %72 : vector<24x1xi1> to vector<24x256xi1>
    %74 = arith.select %73, %71, %6 : vector<24x256xi1>, vector<24x256xf32>
    %c0_22 = arith.constant 0 : index
    %c0_23 = arith.constant 0 : index
    %c0_24 = arith.constant 0 : index
    %75 = vector.load %arg3[%c0_22, %c0_23, %c0_24] : memref<1x24x256xf32, #tpu.memory_space<vmem>>, vector<1x24x256xf32>
    %76 = vector.shape_cast %75 : vector<1x24x256xf32> to vector<24x256xf32>
    %77 = vector.shape_cast %74 : vector<24x256xf32> to vector<1x24x256xf32>
    tpu.vector_store %arg3[%c0_22, %c0_23, %c0_24], %77 {strides = array<i32>} : memref<1x24x256xf32, #tpu.memory_space<vmem>>, vector<1x24x256xf32>,
    return
  }
  func.func @transform_0(%arg0: i32, %arg1: i32) -> (i32, i32, i32) {
    %c0_i32 = arith.constant 0 : i32
    %c0_i32_0 = arith.constant 0 : i32
    return %arg0, %c0_i32, %arg1 : i32, i32, i32
  }
  func.func @transform_1(%arg0: i32, %arg1: i32) -> (i32, i32, i32) {
    %c0_i32 = arith.constant 0 : i32
    %c0_i32_0 = arith.constant 0 : i32
    return %arg0, %c0_i32, %arg1 : i32, i32, i32
  }
}

</mosaic_0001>

<bundles_post_ra>
// kernel: tpu_custom_call.1
= control target key start
LH: loop header
LB: loop body
LE: loop exit
PB: predicated region body
PF: predicated region fallthrough
CT: control target
= control target key end

     0   :  { %6 = vsyncpa [#allocation3], 0  ;;  %s1013_s0 = inlined_call_operand.hbm [shape: f32[2,24,256], index: 0, kind: input, shape index: {}]   ;;  %s1014_s1 = inlined_call_operand.hbm [shape: f32[2,24,256], index: 1, kind: output, shape index: {}]  }
   0x1   :  { %8 = vsyncpa [#allocation3 + $0x1], 0 }
   0x2   :  { %9 = vsyncpa [#allocation4], 0 }
   0x3   :  { %11 = vsyncpa [#allocation4 + $0x1], 0  ;;  %s706_s6 = smov 0   ;;  %s708_s7 = smov 0  }
   0x4   :  { %s710_s8 = smov 0   ;;  %s712_s9 = smov 0  }
   0x5   :  { %s714_s10 = smov 0   ;;  %s716_s11 = smov 0  }
   0x6 LB: > { %s453_s12 = sadd.s32 4294967295, %s687_s11   ;;  %s454_s13 = sadd.s32 4294967294, %s687_s11   ;;  %s687_s11 = sphi %s716_s11, %s17_s11   ;;  %s683_s10 = sphi %s714_s10, %s1029_s10   ;;  %s679_s9 = sphi %s712_s9, %s1028_s9   ;;  %s675_s8 = sphi %s710_s8, %s1027_s8   ;;  %s671_s7 = sphi %s708_s7, %s1026_s7   ;;  %s667_s6 = sphi %s706_s6, %s1025_s6  }
   0x7   : > { %s29_s14 = sadd.s32 1, %s683_s10  ;;  %s38_s15 = sadd.s32 1, %s675_s8 }
   0x8   : > { %p31_p0 = scmp.ge.s32.totalorder %s29_s14, 2  ;;  %p45_p1 = scmp.ne.s32.totalorder %s675_s8, %s671_s7 }
   0x9   : > { %p46_p2 = scmp.eq.s32.totalorder %s687_s11, 0  ;;  %p51_p3 = scmp.ne.s32.totalorder %s671_s7, %s667_s6 }
   0xa   : > { %s1031_s14 = smov (%p31_p0, %s29_s14), 0  ;;  %p52_p5 = scmp.eq.s32.totalorder %s453_s12, 0 }
   0xb   : > { %p747_p4 = por %p46_p2, %p45_p1  ;;  %s33_s17 = ssub.s32 %s683_s10, %s1031_s14 }
   0xc   : > { %p77_p6 = scmp.eq.s32.totalorder %s453_s12, 1  ;;  %p36_p7 = scmp.eq.s32.totalorder %s33_s17, 0 }
   0xd   : > { %p753_p8 = por %p52_p5, %p51_p3  ;;  %p83_p10 = scmp.eq.s32.totalorder %s454_s13, 1 }
   0xe   : > { %p757_p9 = por %p77_p6, %p45_p1  ;;  %p484_p13 = scmp.lt.s32.totalorder %s687_s11, 2 }
   0xf   : > { %s762_s20 = scalar_select %p36_p7, %s675_s8, %s38_s15  }
  0x10   : > { %s1018_s19 = scalar_select %p757_p9, 1, 0 }
  0x11   : > { %p764_p11 = por %p83_p10, %p51_p3  ;;  %s103_s22 = sand.u32 1, %s675_s8  }
  0x12   : > { %s468_s23 = smul.u32 48, %s103_s22  ;;  %p774_p0 = pnand %p484_p13, %p747_p4 }
  0x13   : > { %s1019_s21 = scalar_select %p764_p11, 1, 0 }
  0x14   : > { %s469_s24 = smul.u32 768, %s683_s10  ;;  %s107_s29 = scalar_lea.vmem [#allocation2], %s468_s23 }
  0x15   : > { %s116_s30 = sshll.u32 %s107_s29, 4  ;;  %s786_s2 = scalar_lea.sflag [#allocation3], %s103_s22  ;;  %s783_s30 = int_to_ptr.vmem [resolvable:$true] %s116_s30 }
  0x16   : > { %s781_s28 = scalar_lea.hbm %s1013_s0, %s469_s24  ;;  %p577_p3 = pneg %p774_p0 }
  0x17   : > { %s575_s3 = scalar_lea.hbm %s781_s28, 768  ;;  %s580_s12 = scalar_lea.hbm %s1013_s0, 1536 }
  0x18   : > { %p576_p2 = scmp.ne.s32.totalorder %s781_s28, %s575_s3  ;;  %p581_p6 = scmp.lt.u32.totalorder %s781_s28, %s1013_s0 }
  0x19   : > { %p582_p7 = scmp.lt.u32.totalorder %s580_s12, %s575_s3  ;;  %p584_p13 = scmp.lt.u32.totalorder %s575_s3, %s781_s28 }
  0x1a   : > { %p578_p4 = pnand %p577_p3, %p576_p2 }
  0x1b   : > { %p583_p10 = por %p582_p7, %p581_p6 }
  0x1c   : > { %p579_p5 = pneg %p578_p4 }
  0x1d   : > { %p585_p12 = por %p584_p13, %p583_p10 }
  0x1f   : > { %p586_p1 = pnand %p585_p12, %p579_p5 }
  0x21   : > { %589 = shalt.err (!%p586_p1)
}
  0x22   : > { %s590_s16 = scalar_lea.vmem %s783_s30, 768  ;;  %s689_s17 = smov [#allocation2]  }
  0x23   : > { %p591_p2 = scmp.ne.s32.totalorder %s783_s30, %s590_s16  ;;  %s595_s22 = sshll.u32 %s689_s17, 4  ;;  %s596_s22 = int_to_ptr.vmem [resolvable:$false] %s595_s22 }
  0x24   : > { %s597_s23 = scalar_lea.vmem %s596_s22, 1536  ;;  %p598_p9 = scmp.lt.s32.totalorder %s783_s30, %s596_s22 }
  0x25   : > { %p593_p4 = pnand %p591_p2, %p577_p3  ;;  %p599_p6 = scmp.lt.s32.totalorder %s597_s23, %s590_s16 }
  0x27   : > { %p594_p11 = pneg %p593_p4  ;;  %p600_p7 = por %p599_p6, %p598_p9 }
  0x29   : > { %p601_p10 = pnand %p600_p7, %p594_p11 }
  0x2b   : > { %604 = shalt.err (!%p601_p10)
}
  0x2c   : > { %s690_s24 = smov 256   ;;  %s691_s26 = smov 16  }
  0x2d   : > { %479 = dma.hbm_to_vmem [thread:$0]  (!%p774_p0), %s781_s28, 768, %s783_s30, %s786_s2, %s690_s24, %s690_s24, %s691_s26  }
  0x2e   : > { %p124_p12 = scmp.lt.s32.totalorder %s687_s11, 3  ;;  %p1021_p1 = scmp.ge.s32.totalorder %s687_s11, 1 }
  0x30   : > { %p125_p3 = pnand %p1021_p1, %p124_p12 }
  0x31   : > { %s818_s27 = sand.u32 (!%p125_p3), 1, %s671_s7  }
  0x32   : > { %128 = sbr.rel (%p125_p3) target bundleno = 123 (0x7b), region = 24  ;;  %s131_s3 = scalar_lea.sflag (!%p125_p3), [#allocation3], %s818_s27 }
  0x33   : > { %s470_s29 = smul.u32 (!%p125_p3), 48, %s818_s27 }
  0x35   : > { %s824_s4 = scalar_lea.vmem (!%p125_p3), [#allocation2], %s470_s29 }
  0x39   : > { %658 = dma.done.wait (%p753_p8), %s131_s3, 768  }
  0x3a   : > { %660 = vsyncadd (%p753_p8), %s131_s3, 4294966528  ;;  %v209_v0 = vlaneseq  ;;  %v155_v6 = vld [vmem:[%s824_s4] sm:$0xff]  ;;  %v156_v7 = vld [vmem:[%s824_s4 + $0x8] sm:$0xff]  ;;  %v692_v24 = vmov 0.0   ;;  %s921_s18 = scalar_lea.vmem [#allocation5], %s470_s29  ;;  %s471_s28 = smul.u32 768, %s679_s9 }
  0x3b   : > { %v459_v8 = vmul.f32 -1.442695, %v155_v6  ;;  %v460_v10 = vmul.f32 -1.442695, %v156_v7  ;;  %v157_v15 = vld [vmem:[%s824_s4 + $0x10] sm:$0xff]  ;;  %v158_v18 = vld [vmem:[%s824_s4 + $0x18] sm:$0xff] }
  0x3c   : > { %v210_v1 = vshrl.u32 %v209_v0, 7  ;;  %v830_v4 = vand.u32 127, %v209_v0  ;;  %v197_v19 = vmul.f32 1.442695, %v155_v6  ;;  %v461_v22 = vmul.f32 -1.442695, %v157_v15  ;;  %s963_s5 = scalar_lea.hbm %s1014_s1, %s471_s28 }
  0x3d   : > { %539 = vpow2.f32 %v459_v8  ;;  %v462_v27 = vmul.f32 -1.442695, %v158_v18  ;;  %v199_v28 = vmul.f32 1.442695, %v156_v7  ;;  %v159_v31 = vld [vmem:[%s824_s4 + $0x20] sm:$0xff]  ;;  %v160_v41 = vld [vmem:[%s824_s4 + $0x28] sm:$0xff] }
  0x3e   : > { %v213_v2 = vcvt.s32.f32 %v210_v1  ;;  %v832_v5 = vadd.s32 8, %v210_v1  ;;  %v276_v9 = vcvt.s32.f32 %v830_v4  ;;  %v838_v12 = vadd.s32 128, %v830_v4  ;;  %s366_s25 = sshll.u32 %s921_s18, 4  ;;  %s351_s12 = scalar_lea.sflag [#allocation4], %s818_s27  ;;  %s957_s25 = int_to_ptr.vmem [resolvable:$true] %s366_s25 }
  0x3f   : > { %541 = vpow2.f32 %v460_v10  ;;  %v850_v23 = vadd.s32 16, %v210_v1  ;;  %v463_v37 = vmul.f32 -1.442695, %v159_v31  ;;  %v201_v45 = vmul.f32 1.442695, %v157_v15  ;;  %s605_s13 = scalar_lea.vmem %s957_s25, 768 }
  0x40   : > { %v217_v3 = vmul.f32 0.125, %v213_v2  ;;  %v214_v13 = vcvt.s32.f32 %v832_v5  ;;  %v282_v14 = vmul.f32 0.0625, %v276_v9  ;;  %v277_v16 = vcvt.s32.f32 %v838_v12  ;;  %p606_p8 = scmp.ne.s32.totalorder %s957_s25, %s605_s13  ;;  %p1022_p9 = scmp.ne.s32.totalorder %s1018_s19, 0 }
  0x41   : > { %543 = vpow2.f32 %v461_v22  ;;  %v215_v38 = vcvt.s32.f32 %v850_v23  ;;  %v464_v50 = vmul.f32 -1.442695, %v160_v41  ;;  %v203_v53 = vmul.f32 1.442695, %v158_v18  ;;  %s693_s9 = smov [#allocation5]  }
  0x42   : > { %v220_v11 = vfloor.f32 %v217_v3  ;;  %v218_v17 = vmul.f32 0.125, %v214_v13  ;;  %v848_v21 = vfloor.f32 %v282_v14  ;;  %v283_v29 = vmul.f32 0.0625, %v277_v16  ;;  %p607_p11 = pnand %p606_p8, %p1022_p9  ;;  %s609_s15 = sshll.u32 %s693_s9, 4  ;;  %s610_s15 = int_to_ptr.vmem [resolvable:$false] %s609_s15 }
  0x43   : > { %545 = vpow2.f32 %v197_v19  ;;  %v219_v49 = vmul.f32 0.125, %v215_v38  ;;  %v205_v63 = vmul.f32 1.442695, %v159_v31  ;;  %v207_v10 = vmul.f32 1.442695, %v160_v41  ;;  %s611_s16 = scalar_lea.vmem %s610_s15, 1536  ;;  %p612_p5 = scmp.lt.s32.totalorder %s957_s25, %s610_s15 }
  0x44   : > { %vm238_vm0 = vcmp.eq.f32.partialorder %v220_v11, 0.0  ;;  %v223_v20 = vmul.f32 8.0, %v220_v11  ;;  %vm247_vm1 = vcmp.eq.f32.partialorder %v220_v11, 1.0  ;;  %v221_v30 = vfloor.f32 %v218_v17  ;;  %p608_p0 = pneg %p607_p11  ;;  %p613_p13 = scmp.lt.s32.totalorder %s611_s16, %s605_s13 }
  0x45   : > { %v241_v25 = vsel %vm238_vm0, 1.25, %v692_v24  ;;  %v244_v26 = vsel %vm238_vm0, 1.625, %v692_v24  ;;  %vm256_vm2 = vcmp.eq.f32.partialorder %v220_v11, 2.0  ;;  %547 = vpow2.f32 %v462_v27 }
  0x46   : > { %v857_v33 = vsub.f32 %v213_v2, %v223_v20  ;;  %v250_v34 = vsel %vm247_vm1, 2.0, %v241_v25  ;;  %v253_v35 = vsel %vm247_vm1, 3.75, %v244_v26  ;;  %v286_v39 = vmul.f32 16.0, %v848_v21  ;;  %p614_p2 = por %p613_p13, %p612_p5 }
  0x47   : > { %v540_v32 = vpop.eup %539  ;;  %549 = vpow2.f32 %v199_v28  ;;  %v861_v40 = vfloor.f32 %v283_v29  ;;  %vm239_vm3 = vcmp.eq.f32.partialorder %v221_v30, 0.0  ;;  %v259_v43 = vsel %vm256_vm2, 4.125, %v250_v34 }
  0x48   : > { %v179_v36 = vadd.f32 1.0, %v540_v32  ;;  %v262_v44 = vsel %vm256_vm2, 2.875, %v253_v35  ;;  %vm265_vm4 = vcmp.lt.f32.partialorder %v857_v33, 2.5  ;;  %v224_v47 = vmul.f32 8.0, %v221_v30  ;;  %p615_p4 = pnand %p614_p2, %p608_p0 }
  0x49   : > { %v542_v42 = vpop.eup %541  ;;  %vm248_vm5 = vcmp.eq.f32.partialorder %v221_v30, 1.0  ;;  %v242_v48 = vsel %vm239_vm3, 1.25, %v692_v24  ;;  %v287_v51 = vmul.f32 16.0, %v861_v40  ;;  %v245_v52 = vsel %vm239_vm3, 1.625, %v692_v24 }
  0x4a   : > { %551 = vrcp.f32 %v179_v36  ;;  %v180_v46 = vadd.f32 1.0, %v542_v42  ;;  %vm229_vm6 = vcmp.lt.f32.partialorder %v857_v33, 0.5  ;;  %v268_v54 = vsel %vm265_vm4, %v259_v43, %v262_v44 }
  0x4b   : > { %553 = vpow2.f32 %v463_v37  ;;  %v875_v55 = vsub.f32 %v276_v9, %v286_v39  ;;  %v544_v56 = vpop.eup %543  ;;  %v251_v57 = vsel %vm248_vm5, 2.0, %v242_v48  ;;  %vm257_vm7 = vcmp.eq.f32.partialorder %v221_v30, 2.0 }
  0x4c   : > { %555 = vrcp.f32 %v180_v46  ;;  %v222_v58 = vfloor.f32 %v219_v49  ;;  %v181_v60 = vadd.f32 1.0, %v544_v56  ;;  %v880_v61 = vsub.f32 %v214_v13, %v224_v47 }
  0x4d   : > { %557 = vpow2.f32 %v201_v45  ;;  %v546_v59 = vpop.eup %545  ;;  %v254_v62 = vsel %vm248_vm5, 3.75, %v245_v52  ;;  %v885_v0 = vsub.f32 %v277_v16, %v287_v51  ;;  %vm232_vm8 = vcmp.lt.f32.partialorder %v857_v33, 1.5 }
  0x4e   : > { %559 = vpow2.f32 %v464_v50  ;;  %v296_v2 = vsel %vm229_vm6, %v875_v55, %v848_v21  ;;  %v260_v3 = vsel %vm257_vm7, 4.125, %v251_v57  ;;  %v308_v5 = vmul.f32 %v546_v59, %v268_v54 }
  0x4f   : > { %561 = vpow2.f32 %v203_v53  ;;  %v548_v1 = vpop.eup %547  ;;  %v263_v6 = vsel %vm257_vm7, 2.875, %v254_v62  ;;  %vm240_vm9 = vcmp.eq.f32.partialorder %v222_v58, 0.0  ;;  %vm266_vm10 = vcmp.lt.f32.partialorder %v880_v61, 2.5 }
  0x50   : > { %563 = vrcp.f32 %v181_v60  ;;  %v182_v7 = vadd.f32 1.0, %v548_v1  ;;  %v225_v9 = vmul.f32 8.0, %v222_v58  ;;  %vm235_vm11 = vcmp.lt.f32.partialorder %v857_v33, 3.5 }
  0x51   : > { %v550_v4 = vpop.eup %549  ;;  %565 = vpow2.f32 %v205_v63  ;;  %v297_v12 = vsel %vm229_vm6, %v885_v0, %v861_v40  ;;  %v243_v15 = vsel %vm240_vm9, 1.25, %v692_v24  ;;  %v246_v16 = vsel %vm240_vm9, 1.625, %v692_v24 }
  0x52   : > { %567 = vrcp.f32 %v182_v7  ;;  %v309_v14 = vmul.f32 %v550_v4, %v268_v54  ;;  %vm249_vm12 = vcmp.eq.f32.partialorder %v222_v58, 1.0  ;;  %vm230_vm13 = vcmp.lt.f32.partialorder %v880_v61, 0.5 }
  0x53   : > { %v269_v19 = vsel %vm266_vm10, %v260_v3, %v263_v6  ;;  %v909_v27 = vsub.f32 %v215_v38, %v225_v9  ;;  %569 = vpow2.f32 %v207_v10  ;;  %v252_v28 = vsel %vm249_vm12, 2.0, %v243_v15 }
  0x54   : > { %v552_v8 = vpop.eup %551  ;;  %v255_v29 = vsel %vm249_vm12, 3.75, %v246_v16  ;;  %vm258_vm14 = vcmp.eq.f32.partialorder %v222_v58, 2.0  ;;  %v298_v32 = vsel %vm230_vm13, %v875_v55, %v848_v21  ;;  %vm233_vm15 = vcmp.lt.f32.partialorder %v880_v61, 1.5 }
  0x55   : > { %v302_v11 = vadd.f32 %v552_v8, %v296_v2  ;;  %v554_v13 = vpop.eup %553  ;;  %v261_v38 = vsel %vm258_vm14, 4.125, %v252_v28  ;;  %v264_v39 = vsel %vm258_vm14, 2.875, %v255_v29  ;;  %vm267_vm0 = vcmp.lt.f32.partialorder %v909_v27, 2.5 }
  0x56   : > { %v556_v17 = vpop.eup %555  ;;  %v183_v20 = vadd.f32 1.0, %v554_v13  ;;  %v299_v43 = vsel %vm230_vm13, %v885_v0, %v861_v40  ;;  %vm231_vm1 = vcmp.lt.f32.partialorder %v909_v27, 0.5  ;;  %vm236_vm2 = vcmp.lt.f32.partialorder %v880_v61, 3.5 }
  0x57   : > { %v320_v18 = vsel %vm232_vm8, %v302_v11, %v308_v5  ;;  %v558_v22 = vpop.eup %557  ;;  %v303_v26 = vadd.f32 %v556_v17, %v297_v12  ;;  %v270_v33 = vsel %vm267_vm0, %v261_v38, %v264_v39  ;;  %v300_v50 = vsel %vm231_vm1, %v875_v55, %v848_v21 }
  0x58   : > { %v326_v25 = vmul.f32 8.0, %v320_v18  ;;  %v560_v24 = vpop.eup %559  ;;  %571 = vrcp.f32 %v183_v20  ;;  %v310_v36 = vmul.f32 %v558_v22, %v269_v19  ;;  %vm234_vm3 = vcmp.lt.f32.partialorder %v909_v27, 1.5 }
  0x59   : > { %v321_v31 = vsel %vm232_vm8, %v303_v26, %v309_v14  ;;  %v184_v23 = vadd.f32 1.0, %v560_v24  ;;  %v562_v34 = vpop.eup %561  ;;  %v301_v21 = vsel %vm231_vm1, %v885_v0, %v861_v40  ;;  %vm237_vm4 = vcmp.lt.f32.partialorder %v909_v27, 3.5 }
  0x5a   : > { %v338_v30 = vsel %vm235_vm11, %v326_v25, %v552_v8  ;;  %v327_v35 = vmul.f32 8.0, %v321_v31  ;;  %v564_v37 = vpop.eup %563  ;;  %v311_v45 = vmul.f32 %v562_v34, %v269_v19 }
  0x5b   : > { %344 = vst [vmem:[%s921_s18] sm:$0xff] %v338_v30  ;;  %573 = vrcp.f32 %v184_v23  ;;  %v304_v42 = vadd.f32 %v564_v37, %v298_v32  ;;  %v566_v44 = vpop.eup %565 }
  0x5c   : > { %v339_v41 = vsel %vm235_vm11, %v327_v35, %v556_v17  ;;  %v568_v46 = vpop.eup %567  ;;  %v312_v54 = vmul.f32 %v566_v44, %v270_v33 }
  0x5d   : > { %345 = vst [vmem:[%s921_s18 + $0x8] sm:$0xff] %v339_v41  ;;  %v322_v47 = vsel %vm233_vm15, %v304_v42, %v310_v36  ;;  %v305_v49 = vadd.f32 %v568_v46, %v299_v43  ;;  %v570_v51 = vpop.eup %569 }
  0x5e   : > { %v328_v48 = vmul.f32 8.0, %v322_v47  ;;  %v313_v59 = vmul.f32 %v570_v51, %v270_v33 }
  0x5f   : > { %v323_v53 = vsel %vm233_vm15, %v305_v49, %v311_v45 }
  0x60   : > { %v340_v52 = vsel %vm236_vm2, %v328_v48, %v564_v37  ;;  %v329_v57 = vmul.f32 8.0, %v323_v53 }
  0x61   : > { %346 = vst [vmem:[%s921_s18 + $0x10] sm:$0xff] %v340_v52 }
  0x62   : > { %v572_v56 = vpop.eup %571  ;;  %v341_v55 = vsel %vm236_vm2, %v329_v57, %v568_v46 }
  0x63   : > { %v306_v58 = vadd.f32 %v572_v56, %v300_v50  ;;  %347 = vst [vmem:[%s921_s18 + $0x18] sm:$0xff] %v341_v55 }
  0x65   : > { %v574_v60 = vpop.eup %573  ;;  %v324_v62 = vsel %vm234_vm3, %v306_v58, %v312_v54 }
  0x66   : > { %v330_v63 = vmul.f32 8.0, %v324_v62  ;;  %v307_v1 = vadd.f32 %v574_v60, %v301_v21 }
  0x68   : > { %v342_v2 = vsel %vm237_vm4, %v330_v63, %v572_v56  ;;  %v325_v3 = vsel %vm234_vm3, %v307_v1, %v313_v59 }
  0x69   : > { %348 = vst [vmem:[%s921_s18 + $0x20] sm:$0xff] %v342_v2  ;;  %v331_v40 = vmul.f32 8.0, %v325_v3 }
  0x6b   : > { %v343_v61 = vsel %vm237_vm4, %v331_v40, %v574_v60 }
  0x6c   : > { %349 = vst [vmem:[%s921_s18 + $0x28] sm:$0xff] %v343_v61 }
  0x6d   : > { %618 = shalt.err (!%p615_p4)
}
  0x6e   : > { %s619_s17 = scalar_lea.hbm %s963_s5, 768  ;;  %s623_s24 = scalar_lea.hbm %s1014_s1, 1536 }
  0x6f   : > { %p620_p6 = scmp.ne.s32.totalorder %s963_s5, %s619_s17  ;;  %p624_p12 = scmp.lt.u32.totalorder %s963_s5, %s1014_s1 }
  0x70   : > { %p625_p1 = scmp.lt.u32.totalorder %s623_s24, %s619_s17  ;;  %p627_p8 = scmp.lt.u32.totalorder %s619_s17, %s963_s5 }
  0x71   : > { %p621_p7 = pnand %p620_p6, %p1022_p9 }
  0x72   : > { %p626_p3 = por %p625_p1, %p624_p12 }
  0x73   : > { %p622_p10 = pneg %p621_p7 }
  0x74   : > { %p628_p11 = por %p627_p8, %p626_p3 }
  0x76   : > { %p629_p0 = pnand %p628_p11, %p622_p10 }
  0x78   : > { %632 = shalt.err (!%p629_p0)
}
  0x79   : > { %s694_s3 = smov 256   ;;  %s695_s4 = smov 16  }
  0x7a   : > { %474 = dma.vmem_to_hbm [thread:$0]  (%p1022_p9), %s957_s25, 768, %s963_s5, %s351_s12, %s694_s3, %s694_s3, %s695_s4  }
  0x7b PF: > { %s381_s18 = sand.u32 1, %s667_s6   ;;  %p1023_p5 = scmp.ne.s32.totalorder %s1019_s21, 0 }
  0x7c   : > { %p1024_p13 = scmp.ge.s32.totalorder %s687_s11, 2  ;;  %s382_s28 = scalar_lea.sflag [#allocation4], %s381_s18 }
  0x7e   : > { %p481_p2 = pnand %p1024_p13, %p1023_p5 }
  0x80   : > { %662 = dma.done.wait (!%p481_p2), %s382_s28, 768  }
  0x81   : > { %664 = vsyncadd (!%p481_p2), %s382_s28, 4294966528  ;;  %s17_s11 = sadd.s32 1, %s687_s11   ;;  %s1025_s6 = smov %s671_s7 }
  0x82   : > { %p14_p4 = scmp.ge.s32.totalorder %s17_s11, 4   ;;  %s1026_s7 = smov %s675_s8 }
  0x83   : > { %s1027_s8 = smov %s762_s20  ;;  %s1028_s9 = smov %s683_s10 }
  0x84   : > { %s1029_s10 = smov %s1031_s14  ;;  %16 = sbr.rel (!%p14_p4) target bundleno = 6 (0x6), region = 69 }
  0x8b   :  { %387 = vsyncpa [#allocation3], 1 }
  0x8c   :  { %389 = vsyncpa [#allocation3 + $0x1], 1 }
  0x8d   :  { %390 = vsyncpa [#allocation4], 1 }
  0x8e   :  { %392 = vsyncpa [#allocation4 + $0x1], 1 }

</bundles_post_ra>
